<compile_context>
chip_gen: v7x
topology: tpu7x:2x2x1
jax: 0.10.0
libtpu: 0.0.40
codegen_flags: <defaults>
</compile_context>

<pallas_src>
import functools

import jax
import jax.numpy as jnp
from jax.experimental import pallas as pl
from jax.experimental.pallas import tpu as pltpu

LANES = 128  # pad the "num losses" axis to one full lane register


def _awl_kernel(packed_ref, out_ref, *, num):
    # packed_ref: (2, LANES) f32 in VMEM; row 0 = params, row 1 = losses.
    # out_ref:    (1, 1) f32 in SMEM (scalar result).
    x = packed_ref[...]                      # single whole-tile load
    p = x[0:1, :]                            # (1, LANES)
    loss = x[1:2, :]                         # (1, LANES)

    p2 = p * p
    # 0.5 / p^2 * loss + log(1 + p^2), per task (padded params are 1.0 so the
    # reciprocal stays finite; padded lanes are masked out below).
    term = 0.5 * loss * pl.reciprocal(p2, approx=False) + jnp.log(1.0 + p2)

    # Mask out padded lanes (lane index >= num), built in-kernel.
    lane = jax.lax.broadcasted_iota(jnp.int32, (1, LANES), 1)
    term = jnp.where(lane < num, term, 0.0)

    out_ref[0, 0] = jnp.sum(term)


@functools.partial(jax.jit, static_argnames=("num",))
def awl_forward(params, losses, num):
    """params: (num,) f32 learnable weights; losses: (num,) f32 scalar losses."""
    # Glue: pack params and losses into one (2, LANES) tile.
    # params padded with 1.0 (keeps 1/p^2 finite), losses padded with 0.0.
    p_row = jnp.pad(params.astype(jnp.float32), (0, LANES - num),
                    constant_values=1.0)
    l_row = jnp.pad(losses.astype(jnp.float32), (0, LANES - num),
                    constant_values=0.0)
    packed = jnp.stack([p_row, l_row], axis=0)            # (2, LANES)

    out = pl.pallas_call(
        functools.partial(_awl_kernel, num=num),
        out_shape=jax.ShapeDtypeStruct((1, 1), jnp.float32),
        in_specs=[pl.BlockSpec(memory_space=pltpu.MemorySpace.VMEM)],
        out_specs=pl.BlockSpec(memory_space=pltpu.MemorySpace.SMEM),
    )(packed)
    return out[0, 0]


def awl_reference(params, losses):
    p2 = params.astype(jnp.float32) ** 2
    return jnp.sum(0.5 / p2 * losses.astype(jnp.float32) + jnp.log(1.0 + p2))


if __name__ == "__main__":
    num = 2  # number of tasks (module default)

    # Deterministic parameter init, matching nn.Module default: ones(num).
    params = jnp.ones((num,), jnp.float32)

    # Example multi-task scalar losses.
    key = jax.random.PRNGKey(0)
    losses = jax.random.uniform(key, (num,), jnp.float32, minval=0.5, maxval=3.0)

    out = awl_forward(params, losses, num)
    jax.block_until_ready(out)

    ref = awl_reference(params, losses)
    assert jnp.allclose(out, ref, rtol=1e-5, atol=1e-5), (out, ref)

    print("KERNEL_OK")
</pallas_src>

<mosaic_0001>
module attributes {stable_mosaic.version = 11 : i64} {
  func.func @_awl_kernel(%arg0: memref<2x128xf32, #tpu.memory_space<vmem>>, %arg1: memref<1x1xf32, #tpu.memory_space<smem>>) attributes {dimension_semantics = [], scalar_prefetch = 0 : i64, scratch_operands = 0 : i64, tpu.core_type = #tpu.core_type<tc>} {
    %c0 = arith.constant 0 : index
    %c0_0 = arith.constant 0 : index
    %0 = vector.load %arg0[%c0, %c0_0] : memref<2x128xf32, #tpu.memory_space<vmem>>, vector<2x128xf32>
    %1 = vector.extract_strided_slice %0 {offsets = [0, 0], sizes = [1, 128], strides = [1, 1]} : vector<2x128xf32> to vector<1x128xf32>
    %2 = vector.extract_strided_slice %0 {offsets = [1, 0], sizes = [1, 128], strides = [1, 1]} : vector<2x128xf32> to vector<1x128xf32>
    %3 = arith.mulf %1, %1 : vector<1x128xf32>
    %cst = arith.constant 5.000000e-01 : f32
    %4 = vector.broadcast %cst : f32 to vector<1x128xf32>
    %5 = arith.mulf %4, %2 : vector<1x128xf32>
    %6 = tpu.reciprocal %3 : vector<1x128xf32> -> vector<1x128xf32>
    %7 = arith.mulf %5, %6 : vector<1x128xf32>
    %cst_1 = arith.constant 1.000000e+00 : f32
    %8 = vector.broadcast %cst_1 : f32 to vector<1x128xf32>
    %9 = arith.addf %8, %3 : vector<1x128xf32>
    %10 = math.log %9 : vector<1x128xf32>
    %11 = arith.addf %7, %10 : vector<1x128xf32>
    %12 = tpu.iota {dimensions = array<i32: 1>} : vector<1x128xi32>
    %c2_i32 = arith.constant 2 : i32
    %13 = vector.broadcast %c2_i32 : i32 to vector<1x128xi32>
    %14 = arith.cmpi slt, %12, %13 : vector<1x128xi32>
    %cst_2 = arith.constant 0.000000e+00 : f32
    %15 = vector.broadcast %cst_2 : f32 to vector<1x128xf32>
    %16 = arith.select %14, %11, %15 : vector<1x128xi1>, vector<1x128xf32>
    %17 = vector.shape_cast %16 : vector<1x128xf32> to vector<1x1x128xf32>
    %cst_3 = arith.constant dense<0.000000e+00> : vector<1xf32>
    %18 = vector.multi_reduction <add>, %17, %cst_3 [1, 2] : vector<1x1x128xf32> to vector<1xf32>
    %19 = vector.shape_cast %18 : vector<1xf32> to vector<1x1x1xf32>
    %20 = vector.extract %19[0, 0, 0] : f32 from vector<1x1x1xf32>
    %c0_4 = arith.constant 0 : index
    %c0_5 = arith.constant 0 : index
    %21 = memref.load %arg1[%c0_4, %c0_5] : memref<1x1xf32, #tpu.memory_space<smem>>
    memref.store %20, %arg1[%c0_4, %c0_5] : memref<1x1xf32, #tpu.memory_space<smem>>
    return
  }
}

</mosaic_0001>

<bundles_post_ra>
// kernel: awl_forward.1
= control target key start
LH: loop header
LB: loop body
LE: loop exit
PB: predicated region body
PF: predicated region fallthrough
CT: control target
= control target key end

     0   :  { %s102_s0 = inlined_call_operand.vmem [shape: f32[2,128], index: 0, kind: input, shape index: {}]   ;;  %s103_s1 = inlined_call_operand.hbm [shape: f32[1,1], index: 1, kind: output, shape index: {}]  }
   0x1   :  { %v9_v0 = vld [vmem:[%s102_s0] sm:$0x3] }
   0x2   :  { %6 = vsyncpa [#allocation3], 0  ;;  %v10_v1 = vmul.f32 %v9_v0, %v9_v0  ;;  %v24_v3 = vlaneseq  ;;  %v11_v4 = vmul.f32 0.5, %v9_v0  ;;  %vm31_vm1 = vcmask 1040384   ;;  %s64_s10 = scalar_lea.hbm %s103_s1, 16 }
   0x3   :  { %p65_p0 = scmp.ne.s32.totalorder %s103_s1, %s64_s10  ;;  %p68_p1 = scmp.lt.u32.totalorder %s64_s10, %s103_s1 }
   0x4   :  { %60 = vrcp.f32 %v10_v1  ;;  %v17_v2 = vadd.f32 1.0, %v10_v1  ;;  %v25_v8 = vand.u32 127, %v24_v3 }
   0x5   :  { %p70_p2 = pnand %p68_p1, %p65_p0 }
   0x6   :  { %62 = vlog2.f32 %v17_v2  ;;  %vm26_vm0 = vcmp.lt.s32.totalorder %v25_v8, 2 }
   0xe   :  { %v61_v5 = vpop.eup %60 }
   0xf   :  { %v14_v6 = vrot.slane %v61_v5, 7 }
  0x10   :  { %v63_v7 = vpop.eup %62 }
  0x11   :  { %v16_v9 = vmul.f32 %v14_v6, %v11_v4  ;;  %v19_v10 = vmul.f32 0.6931472, %v63_v7 }
  0x13   :  { %v21_v11 = vrot.slane %v19_v10, 7 }
  0x15   :  { %v23_v12 = vadd.f32 %v21_v11, %v16_v9 }
  0x17   :  { %v27_v13 = vsel %vm26_vm0, %v23_v12, 0.0 }
  0x18   :  { %v29_v14 = vrot.slane %v27_v13, 1 }
  0x1a   :  { %v32_v15 = vsel %vm31_vm1, %v29_v14, 0.0 }
  0x1b   :  { %33 = vadd.xlane.f32.xlu0 %v32_v15 }
  0xa8   :  { %v34_v16 = vpop.xlane.xlu0 %33 }
  0xa9   :  { %v35_v17 = vrot.slane %v34_v16, 4 }
  0xab   :  { %v36_v18 = vadd.f32 %v35_v17, %v34_v16 }
  0xad   :  { %v37_v19 = vrot.slane %v36_v18, 2 }
  0xaf   :  { %v38_v20 = vadd.f32 %v37_v19, %v36_v18 }
  0xb1   :  { %v39_v21 = vrot.slane %v38_v20, 1 }
  0xb3   :  { %v40_v22 = vadd.f32 %v39_v21, %v38_v20 }
  0xb5   :  { %57 = vpush %v40_v22 }
  0xe6   :  { %s58_s0 = spop %57 }
  0xe7   :  { %43 = sst [smem:[#allocation2]] %s58_s0 }
  0xe8   :  { %73 = shalt.err (!%p70_p2)
}
  0xe9   :  { %s76_s15 = smov [#allocation2]  }
  0xea   :  { %51 = dma.smem_to_hbm %s76_s15, 16, %s103_s1, [#allocation3]  }
  0xeb   :  { %74 = dma.done.wait [#allocation3], 16  }
  0xec   :  { %75 = vsyncadd [#allocation3], 4294967280 }
  0xed   :  { %55 = sfence }
  0xee   :  { %56 = vsyncpa [#allocation3], 1 }

</bundles_post_ra>
